<compile_context>
chip_gen: v7x
topology: tpu7x:2x2x1
jax: 0.10.0
libtpu: 0.0.40
codegen_flags: <defaults>
</compile_context>

<pallas_src>
import functools

import jax
import jax.numpy as jnp
from jax.experimental import pallas as pl
from jax.experimental.pallas import tpu as pltpu


def _round_up(n, m):
    return ((n + m - 1) // m) * m


def icarl_fused_kernel(x_ref, w1_ref, b1_ref, w2_ref, b2_ref, out_ref,
                       xpad_ref, acc_ref, *, chunks, k, n_pad):
    """One (batch, spatial-tile) step: lane-pad im2col rows in VMEM, chunked conv-matmul +
    bias + ReLU + pooled-sum into a resident f32 accumulator; classifier on the last tile."""
    t = pl.program_id(1)

    @pl.when(t == 0)
    def _():
        acc_ref[...] = jnp.zeros_like(acc_ref)
        # Zero the persistent lane-padded scratch once per batch element; only the first `k`
        # lanes are overwritten below, so lanes k:128 stay zero for every tile of this batch.
        xpad_ref[...] = jnp.zeros_like(xpad_ref)

    # Lane-pad the K = 9*Cin im2col tile (bf16) into the 128-lane scratch (VMEM-only traffic,
    # hidden under the HBM-bound pipeline).
    xpad_ref[:, 0:k] = x_ref[...]

    # Chunked fused 3x3-conv matmul on the MXU: [chunk,128](bf16) x [128,C_pad](bf16) -> f32,
    # bias + ReLU + row-sum streamed into the pooled accumulator (bounds vreg pressure).
    psum = jnp.zeros_like(acc_ref)
    for (r0, rs) in chunks:                       # static slices -> zero-cost ref views
        y = jnp.dot(xpad_ref[r0:r0 + rs, :], w1_ref[...],
                    preferred_element_type=jnp.float32)
        y = jnp.maximum(y + b1_ref[...], 0.0)
        psum = psum + jnp.sum(y, axis=0, keepdims=True)
    acc_ref[...] += psum

    @pl.when(t == pl.num_programs(1) - 1)
    def _():
        acc = acc_ref[...]
        if n_pad:
            # Zero-padded tail rows contribute exactly relu(b1) each -> subtract them out.
            acc = acc - float(n_pad) * jnp.maximum(b1_ref[...], 0.0)
        feats = acc.astype(jnp.bfloat16)          # 1/HW is folded into w2 in the wrapper
        logits = jnp.dot(feats, w2_ref[...], preferred_element_type=jnp.float32)
        out_ref[...] = (logits + b2_ref[...]).reshape(1, 1, -1)


def icarl_forward(x_nchw, wconv_hwio, bconv, wcls_fd_nc, bcls):
    B, Cin, H, W = x_nchw.shape
    Cout = wconv_hwio.shape[-1]          # feat_dim
    num_class = wcls_fd_nc.shape[-1]
    HW = H * W

    LANE = 128
    K = 9 * Cin                          # 36 for Cin=4 -- kept UNPADDED in HBM
    K_pad = _round_up(max(K, LANE), LANE)
    C_pad = _round_up(max(Cout, LANE), LANE)
    NC_pad = _round_up(max(num_class, LANE), LANE)

    # ---- row tiling: cdiv grid over spatial positions, tail handled by exact bias correction ----
    CHUNK = 256                          # in-kernel matmul row-chunk (f32 y stays ~32 vregs)
    TM_CAP = 1024
    if HW <= CHUNK:
        TM = _round_up(HW, 16)
    else:
        TM = min(TM_CAP, _round_up(HW, CHUNK))   # multiple of CHUNK
    nt = pl.cdiv(HW, TM)
    HW_pad = nt * TM
    n_pad = HW_pad - HW
    if TM <= CHUNK:
        chunks = ((0, TM),)
    else:
        chunks = tuple((c * CHUNK, CHUNK) for c in range(TM // CHUNK))

    # ---- wrapper-side layout plumbing (plain JAX, all in bf16) ----
    # im2col slab: [B*HW_pad, 9*Cin] bf16, tap order (kh, kw, cin) matching wconv.reshape(9*Cin, Cout).
    x_nhwc = jnp.transpose(x_nchw, (0, 2, 3, 1)).astype(jnp.bfloat16)
    xp = jnp.pad(x_nhwc, ((0, 0), (1, 1), (1, 1), (0, 0)))
    patches = [xp[:, kh:kh + H, kw:kw + W, :] for kh in range(3) for kw in range(3)]
    im2col = jnp.concatenate(patches, axis=-1).reshape(B, HW, K)
    if n_pad:
        im2col = jnp.pad(im2col, ((0, 0), (0, n_pad), (0, 0)))
    x2d = im2col.reshape(B * HW_pad, K)                 # K stays 36 -- no HBM lane padding

    # Conv weight: [K_pad, C_pad] bf16 (tiny, padding it in HBM is free); conv bias f32.
    w1 = jnp.pad(wconv_hwio.reshape(K, Cout).astype(jnp.float32),
                 ((0, K_pad - K), (0, C_pad - Cout))).astype(jnp.bfloat16)
    b1 = jnp.pad(bconv.reshape(1, Cout).astype(jnp.float32), ((0, 0), (0, C_pad - Cout)))
    # Classifier weight with 1/HW folded in (exact -- scaling is linear), demoted to bf16.
    w2 = jnp.pad(wcls_fd_nc.astype(jnp.float32) * (1.0 / HW),
                 ((0, C_pad - Cout), (0, NC_pad - num_class))).astype(jnp.bfloat16)
    b2 = jnp.pad(bcls.reshape(1, num_class).astype(jnp.float32),
                 ((0, 0), (0, NC_pad - num_class)))

    kernel = functools.partial(icarl_fused_kernel, chunks=chunks, k=K, n_pad=n_pad)

    out = pl.pallas_call(
        kernel,
        out_shape=jax.ShapeDtypeStruct((B, 1, NC_pad), jnp.float32),
        grid=(B, nt),
        in_specs=[
            pl.BlockSpec((TM, K), lambda b, t: (b * nt + t, 0)),       # im2col row tile (K=36)
            pl.BlockSpec((K_pad, C_pad), lambda b, t: (0, 0)),         # conv weight (resident)
            pl.BlockSpec((1, C_pad), lambda b, t: (0, 0)),             # conv bias
            pl.BlockSpec((C_pad, NC_pad), lambda b, t: (0, 0)),        # classifier weight (bf16)
            pl.BlockSpec((1, NC_pad), lambda b, t: (0, 0)),            # classifier bias
        ],
        out_specs=pl.BlockSpec((1, 1, NC_pad), lambda b, t: (b, 0, 0)),
        scratch_shapes=[
            pltpu.VMEM((TM, K_pad), jnp.bfloat16),                     # lane-padded im2col tile
            pltpu.VMEM((1, C_pad), jnp.float32),                       # pooled-sum accumulator
        ],
        compiler_params=pltpu.CompilerParams(
            dimension_semantics=("parallel", "arbitrary")),
    )(x2d, w1, b1, w2, b2)

    return out.reshape(B, NC_pad)[:, :num_class]


def reference_forward(x_nchw, wconv_hwio, bconv, wcls_fd_nc, bcls):
    """Plain-JAX f32 reference of the same forward (for a sanity check)."""
    x = jnp.transpose(x_nchw, (0, 2, 3, 1)).astype(jnp.float32)
    y = jax.lax.conv_general_dilated(
        x, wconv_hwio.astype(jnp.float32), window_strides=(1, 1), padding="SAME",
        dimension_numbers=("NHWC", "HWIO", "NHWC"))
    y = jnp.maximum(y + bconv[None, None, None, :], 0.0)
    feats = jnp.mean(y, axis=(1, 2))
    return feats @ wcls_fd_nc + bcls[None, :]


if __name__ == "__main__":
    # Small shapes consistent with the module: x NCHW, feat_dim, num_class.
    B, Cin, H, W = 2, 4, 16, 16
    feat_dim, num_class = 32, 10

    key = jax.random.PRNGKey(0)
    kx, kwc, kbc, kwl, kbl = jax.random.split(key, 5)

    x = jax.random.normal(kx, (B, Cin, H, W), dtype=jnp.float32)
    # Synthetic backbone params (conv weight in HWIO layout).
    wconv = jax.random.normal(kwc, (3, 3, Cin, feat_dim), dtype=jnp.float32) * 0.1
    bconv = jax.random.normal(kbc, (feat_dim,), dtype=jnp.float32) * 0.1
    # Classifier params (nn.Linear(feat_dim, num_class)); stored transposed vs PyTorch.
    wcls = jax.random.normal(kwl, (feat_dim, num_class), dtype=jnp.float32) * 0.1
    bcls = jax.random.normal(kbl, (num_class,), dtype=jnp.float32) * 0.1

    fwd = jax.jit(icarl_forward)
    logits = jax.block_until_ready(fwd(x, wconv, bconv, wcls, bcls))

    ref = reference_forward(x, wconv, bconv, wcls, bcls)
    assert logits.shape == (B, num_class)
    # bf16 compute path with f32 accumulation -> slightly looser tolerance than pure f32.
    assert jnp.allclose(logits, ref, atol=2e-2, rtol=2e-2), \
        f"max abs err = {jnp.max(jnp.abs(logits - ref))}"
    print("KERNEL_OK")
</pallas_src>

<mosaic_0001>
module attributes {stable_mosaic.version = 11 : i64} {
  func.func @icarl_fused_kernel(%arg0: i32, %arg1: i32, %arg2: memref<256x36xbf16, #tpu.memory_space<vmem>>, %arg3: memref<128x128xbf16, #tpu.memory_space<vmem>>, %arg4: memref<1x128xf32, #tpu.memory_space<vmem>>, %arg5: memref<128x128xbf16, #tpu.memory_space<vmem>>, %arg6: memref<1x128xf32, #tpu.memory_space<vmem>>, %arg7: memref<1x1x128xf32, #tpu.memory_space<vmem>>, %arg8: memref<256x128xbf16, #tpu.memory_space<vmem>>, %arg9: memref<1x128xf32, #tpu.memory_space<vmem>>) attributes {dimension_semantics = [#tpu.dimension_semantics<parallel>, #tpu.dimension_semantics<arbitrary>], iteration_bounds = array<i64: 2, 1>, scalar_prefetch = 0 : i64, scratch_operands = 2 : i64, tpu.core_type = #tpu.core_type<tc>, window_params = [{transform_indices = @transform_0, window_bounds = array<i64: 256, 36>}, {pipeline_mode = #tpu.pipeline_mode<synchronous>, transform_indices = @transform_1, window_bounds = array<i64: 128, 128>}, {pipeline_mode = #tpu.pipeline_mode<synchronous>, transform_indices = @transform_2, window_bounds = array<i64: 1, 128>}, {pipeline_mode = #tpu.pipeline_mode<synchronous>, transform_indices = @transform_3, window_bounds = array<i64: 128, 128>}, {pipeline_mode = #tpu.pipeline_mode<synchronous>, transform_indices = @transform_4, window_bounds = array<i64: 1, 128>}, {transform_indices = @transform_5, window_bounds = array<i64: 1, 1, 128>}]} {
    %c0_i32 = arith.constant 0 : i32
    %0 = arith.cmpi eq, %arg1, %c0_i32 : i32
    %1 = arith.extui %0 : i1 to i32
    %c0_i32_0 = arith.constant 0 : i32
    %2 = arith.cmpi ne, %1, %c0_i32_0 : i32
    scf.if %2 {
      %cst_19 = arith.constant 0.000000e+00 : f32
      %23 = vector.broadcast %cst_19 : f32 to vector<1x128xf32>
      %c0_20 = arith.constant 0 : index
      %c0_21 = arith.constant 0 : index
      %24 = vector.load %arg9[%c0_20, %c0_21] : memref<1x128xf32, #tpu.memory_space<vmem>>, vector<1x128xf32>
      tpu.vector_store %arg9[%c0_20, %c0_21], %23 {strides = array<i32>} : memref<1x128xf32, #tpu.memory_space<vmem>>, vector<1x128xf32>,
      %cst_22 = arith.constant 0.000000e+00 : bf16
      %25 = vector.broadcast %cst_22 : bf16 to vector<256x128xbf16>
      %c0_23 = arith.constant 0 : index
      %c0_24 = arith.constant 0 : index
      %26 = vector.load %arg8[%c0_23, %c0_24] : memref<256x128xbf16, #tpu.memory_space<vmem>>, vector<256x128xbf16>
      tpu.vector_store %arg8[%c0_23, %c0_24], %25 {strides = array<i32>} : memref<256x128xbf16, #tpu.memory_space<vmem>>, vector<256x128xbf16>,
    } else {
    }
    %c0 = arith.constant 0 : index
    %c0_1 = arith.constant 0 : index
    %3 = vector.load %arg2[%c0, %c0_1] : memref<256x36xbf16, #tpu.memory_space<vmem>>, vector<256x36xbf16>
    %c0_2 = arith.constant 0 : index
    %c0_3 = arith.constant 0 : index
    %4 = vector.load %arg8[%c0_2, %c0_3] : memref<256x128xbf16, #tpu.memory_space<vmem>>, vector<256x36xbf16>
    tpu.vector_store %arg8[%c0_2, %c0_3], %3 {strides = array<i32>} : memref<256x128xbf16, #tpu.memory_space<vmem>>, vector<256x36xbf16>,
    %cst = arith.constant 0.000000e+00 : f32
    %5 = vector.broadcast %cst : f32 to vector<1x128xf32>
    %c0_4 = arith.constant 0 : index
    %c0_5 = arith.constant 0 : index
    %6 = vector.load %arg8[%c0_4, %c0_5] : memref<256x128xbf16, #tpu.memory_space<vmem>>, vector<256x128xbf16>
    %c0_6 = arith.constant 0 : index
    %c0_7 = arith.constant 0 : index
    %7 = vector.load %arg3[%c0_6, %c0_7] : memref<128x128xbf16, #tpu.memory_space<vmem>>, vector<128x128xbf16>
    %cst_8 = arith.constant dense<0.000000e+00> : vector<256x128xf32>
    %8 = tpu.matmul %6, %7, %cst_8 {dimension_numbers = #tpu.dot_dimension_numbers<[1], [0], [0], [1], [0, 0, 1, 1], [], []>} : vector<256x128xbf16>, vector<128x128xbf16>, vector<256x128xf32> -> vector<256x128xf32>
    %c0_9 = arith.constant 0 : index
    %c0_10 = arith.constant 0 : index
    %9 = vector.load %arg4[%c0_9, %c0_10] : memref<1x128xf32, #tpu.memory_space<vmem>>, vector<1x128xf32>
    %10 = vector.broadcast %9 : vector<1x128xf32> to vector<256x128xf32>
    %11 = arith.addf %8, %10 : vector<256x128xf32>
    %cst_11 = arith.constant 0.000000e+00 : f32
    %12 = vector.broadcast %cst_11 : f32 to vector<256x128xf32>
    %13 = arith.maximumf %11, %12 : vector<256x128xf32>
    %cst_12 = arith.constant dense<0.000000e+00> : vector<128xf32>
    %14 = vector.multi_reduction <add>, %13, %cst_12 [0] : vector<256x128xf32> to vector<128xf32>
    %15 = vector.shape_cast %14 : vector<128xf32> to vector<1x128xf32>
    %16 = arith.addf %5, %15 : vector<1x128xf32>
    %c0_13 = arith.constant 0 : index
    %c0_14 = arith.constant 0 : index
    %17 = vector.load %arg9[%c0_13, %c0_14] : memref<1x128xf32, #tpu.memory_space<vmem>>, vector<1x128xf32>
    %18 = arith.addf %17, %16 : vector<1x128xf32>
    %c0_15 = arith.constant 0 : index
    %c0_16 = arith.constant 0 : index
    %19 = vector.load %arg9[%c0_15, %c0_16] : memref<1x128xf32, #tpu.memory_space<vmem>>, vector<1x128xf32>
    tpu.vector_store %arg9[%c0_15, %c0_16], %18 {strides = array<i32>} : memref<1x128xf32, #tpu.memory_space<vmem>>, vector<1x128xf32>,
    %c0_i32_17 = arith.constant 0 : i32
    %20 = arith.cmpi eq, %arg1, %c0_i32_17 : i32
    %21 = arith.extui %20 : i1 to i32
    %c0_i32_18 = arith.constant 0 : i32
    %22 = arith.cmpi ne, %21, %c0_i32_18 : i32
    scf.if %22 {
      %c0_19 = arith.constant 0 : index
      %c0_20 = arith.constant 0 : index
      %23 = vector.load %arg9[%c0_19, %c0_20] : memref<1x128xf32, #tpu.memory_space<vmem>>, vector<1x128xf32>
      %24 = arith.truncf %23 : vector<1x128xf32> to vector<1x128xbf16>
      %c0_21 = arith.constant 0 : index
      %c0_22 = arith.constant 0 : index
      %25 = vector.load %arg5[%c0_21, %c0_22] : memref<128x128xbf16, #tpu.memory_space<vmem>>, vector<128x128xbf16>
      %cst_23 = arith.constant dense<0.000000e+00> : vector<1x128xf32>
      %26 = tpu.matmul %24, %25, %cst_23 {dimension_numbers = #tpu.dot_dimension_numbers<[1], [0], [0], [1], [0, 0, 1, 1], [], []>} : vector<1x128xbf16>, vector<128x128xbf16>, vector<1x128xf32> -> vector<1x128xf32>
      %c0_24 = arith.constant 0 : index
      %c0_25 = arith.constant 0 : index
      %27 = vector.load %arg6[%c0_24, %c0_25] : memref<1x128xf32, #tpu.memory_space<vmem>>, vector<1x128xf32>
      %28 = arith.addf %26, %27 : vector<1x128xf32>
      %29 = vector.shape_cast %28 : vector<1x128xf32> to vector<1x1x128xf32>
      %c0_26 = arith.constant 0 : index
      %c0_27 = arith.constant 0 : index
      %c0_28 = arith.constant 0 : index
      %30 = vector.load %arg7[%c0_26, %c0_27, %c0_28] : memref<1x1x128xf32, #tpu.memory_space<vmem>>, vector<1x1x128xf32>
      tpu.vector_store %arg7[%c0_26, %c0_27, %c0_28], %29 {strides = array<i32>} : memref<1x1x128xf32, #tpu.memory_space<vmem>>, vector<1x1x128xf32>,
    } else {
    }
    return
  }
  func.func @transform_0(%arg0: i32, %arg1: i32) -> (i32, i32) {
    %c1_i32 = arith.constant 1 : i32
    %0 = arith.muli %arg0, %c1_i32 : i32
    %1 = arith.addi %0, %arg1 : i32
    %c0_i32 = arith.constant 0 : i32
    %c0_i32_0 = arith.constant 0 : i32
    return %1, %c0_i32 : i32, i32
  }
  func.func @transform_1(%arg0: i32, %arg1: i32) -> (i32, i32) {
    %c0_i32 = arith.constant 0 : i32
    %c0_i32_0 = arith.constant 0 : i32
    %c0_i32_1 = arith.constant 0 : i32
    return %c0_i32, %c0_i32_0 : i32, i32
  }
  func.func @transform_2(%arg0: i32, %arg1: i32) -> (i32, i32) {
    %c0_i32 = arith.constant 0 : i32
    %c0_i32_0 = arith.constant 0 : i32
    %c0_i32_1 = arith.constant 0 : i32
    return %c0_i32, %c0_i32_0 : i32, i32
  }
  func.func @transform_3(%arg0: i32, %arg1: i32) -> (i32, i32) {
    %c0_i32 = arith.constant 0 : i32
    %c0_i32_0 = arith.constant 0 : i32
    %c0_i32_1 = arith.constant 0 : i32
    return %c0_i32, %c0_i32_0 : i32, i32
  }
  func.func @transform_4(%arg0: i32, %arg1: i32) -> (i32, i32) {
    %c0_i32 = arith.constant 0 : i32
    %c0_i32_0 = arith.constant 0 : i32
    %c0_i32_1 = arith.constant 0 : i32
    return %c0_i32, %c0_i32_0 : i32, i32
  }
  func.func @transform_5(%arg0: i32, %arg1: i32) -> (i32, i32, i32) {
    %c0_i32 = arith.constant 0 : i32
    %c0_i32_0 = arith.constant 0 : i32
    %c0_i32_1 = arith.constant 0 : i32
    return %arg0, %c0_i32, %c0_i32_0 : i32, i32, i32
  }
}

</mosaic_0001>

<bundles_post_ra>
// kernel: icarl_forward.1
= control target key start
LH: loop header
LB: loop body
LE: loop exit
PB: predicated region body
PF: predicated region fallthrough
CT: control target
= control target key end

     0   :  { %10 = vsyncpa [#allocation5], 0  ;;  %s1499_s0 = inlined_call_operand.vmem [shape: bf16[512,36], index: 0, kind: input, shape index: {}]   ;;  %s1500_s1 = inlined_call_operand.vmem [shape: bf16[128,128], index: 1, kind: input, shape index: {}]   ;;  %s1501_s2 = inlined_call_operand.vmem [shape: f32[1,128], index: 2, kind: input, shape index: {}]   ;;  %s1502_s3 = inlined_call_operand.vmem [shape: bf16[128,128], index: 3, kind: input, shape index: {}]   ;;  %s1503_s4 = inlined_call_operand.vmem [shape: f32[1,128], index: 4, kind: input, shape index: {}]   ;;  %s1504_s5 = inlined_call_operand.hbm [shape: f32[2,1,128], index: 5, kind: output, shape index: {}]  }
   0x1   :  { %12 = vsyncpa [#allocation5 + $0x1], 0  ;;  %s1266_s18 = smov 0   ;;  %s1268_s19 = smov 0  }
   0x2   :  { %s1270_s20 = smov 0   ;;  %s1272_s21 = smov 0  }
   0x3   :  { %s1274_s22 = smov 0   ;;  %s1276_s23 = smov 0  }
   0x4 LB: > { %s918_s24 = sadd.s32 4294967295, %s1230_s23   ;;  %s919_s25 = sadd.s32 4294967294, %s1230_s23   ;;  %s1230_s23 = sphi %s1276_s23, %s18_s23   ;;  %s1226_s22 = sphi %s1274_s22, %s1511_s22   ;;  %s1222_s21 = sphi %s1272_s21, %s1510_s21   ;;  %s1218_s20 = sphi %s1270_s20, %s1509_s20   ;;  %s1214_s19 = sphi %s1268_s19, %s1508_s19   ;;  %s1210_s18 = sphi %s1266_s18, %s1507_s18  }
   0x5   : > { %s30_s26 = sadd.s32 1, %s1226_s22  ;;  %s149_s27 = sadd.s32 1, %s1218_s20 }
   0x6   : > { %p32_p0 = scmp.ge.s32.totalorder %s30_s26, 2  ;;  %p159_p1 = scmp.ne.s32.totalorder %s1218_s20, %s1214_s19 }
   0x7   : > { %p160_p2 = scmp.eq.s32.totalorder %s918_s24, 1  ;;  %p165_p3 = scmp.ne.s32.totalorder %s1214_s19, %s1210_s18 }
   0x8   : > { %s1513_s26 = smov (%p32_p0, %s30_s26), 0  ;;  %p166_p5 = scmp.eq.s32.totalorder %s919_s25, 1 }
   0x9   : > { %p1306_p4 = por %p160_p2, %p159_p1  ;;  %s146_s29 = ssub.s32 %s1226_s22, %s1513_s26 }
   0xa   : > { %p922_p6 = scmp.ge.s32.totalorder %s1230_s23, 1  ;;  %p147_p7 = scmp.eq.s32.totalorder %s146_s29, 0 }
   0xb   : > { %p1313_p8 = por %p166_p5, %p165_p3  ;;  %p207_p9 = scmp.lt.s32.totalorder %s1230_s23, 3 }
   0xc   : > { %s1319_s6 = scalar_select %p147_p7, %s1218_s20, %s149_s27  }
   0xd   : > { %p208_p10 = pnand %p922_p6, %p207_p9 }
   0xe   : > { %v1120_v0 = vld [vmem:[%s1500_s1] sm:$0xff] (!%p208_p10)   ;;  %s923_s9 = sshll.u32 (!%p208_p10), %s1222_s21, 5  ;;  %v1121_v1 = vld [vmem:[%s1500_s1 + $0x8] sm:$0xff] (!%p208_p10)   ;;  %v1232_v2 = vmov (!%p208_p10), 0   ;;  %v1122_v3 = vld [vmem:[%s1500_s1 + $0x10] sm:$0xff] (!%p208_p10)   ;;  %vm393_vm0 = vcmask (!%p208_p10), 293888  }
   0xf   : > { %211 = sbr.rel (%p208_p10) target bundleno = 580 (0x244), region = 40  ;;  %p237_p11 = scmp.lt.s32.totalorder (!%p208_p10), %s923_s9, 63  ;;  %994 = vmatprep.subr.bf16.mxu0 (!%p208_p10), %v1120_v0  ;;  %249 = vst [vmem:[#allocation2] sm:$0xff] (!%p208_p10), %v1232_v2  ;;  %250 = vst [vmem:[#allocation2 + $0x8] sm:$0xff] (!%p208_p10), %v1232_v2  ;;  %v1123_v4 = vld [vmem:[%s1500_s1 + $0x18] sm:$0xff] (!%p208_p10)   ;;  %v1124_v7 = vld [vmem:[%s1500_s1 + $0x20] sm:$0xff] (!%p208_p10)  }
  0x10   : > { %995 = vmatpush3.bf16.msra.mxu0 (!%p208_p10), %v1120_v0  ;;  %251 = vst [vmem:[#allocation2 + $0x10] sm:$0xff] (!%p208_p10), %v1232_v2  ;;  %252 = vst [vmem:[#allocation2 + $0x18] sm:$0xff] (!%p208_p10), %v1232_v2  ;;  %v1125_v12 = vld [vmem:[%s1500_s1 + $0x28] sm:$0xff] (!%p208_p10)   ;;  %v1126_v19 = vld [vmem:[%s1500_s1 + $0x30] sm:$0xff] (!%p208_p10)   ;;  %v1233_v42 = vmov (!%p208_p10), 0.0   ;;  %vm1234_vm1 = vmmov (!%p208_p10), 0  }
  0x11   : > { %253 = vst [vmem:[#allocation2 + $0x20] sm:$0xff] (!%p208_p10), %v1232_v2  ;;  %254 = vst [vmem:[#allocation2 + $0x28] sm:$0xff] (!%p208_p10), %v1232_v2  ;;  %996 = vmatprep.subr.bf16.mxu0 (!%p208_p10), %v1121_v1  ;;  %v1127_v22 = vld [vmem:[%s1500_s1 + $0x38] sm:$0xff] (!%p208_p10)   ;;  %v1144_v41 = vld [vmem:[%s1502_s3] sm:$0xff] (!%p208_p10)   ;;  %1042 = vmatprep.subr.bf16.mxu1 (!%p208_p10), %v1233_v42  ;;  %s233_s16 = sand.u32 (!%p208_p10), 1, %s1214_s19   ;;  %s958_s25 = sshll.u32 (!%p208_p10), %s1222_s21, 4 }
  0x12   : > { %255 = vst [vmem:[#allocation2 + $0x30] sm:$0xff] (!%p208_p10), %v1232_v2  ;;  %256 = vst [vmem:[#allocation2 + $0x38] sm:$0xff] (!%p208_p10), %v1232_v2  ;;  %1043 = vmatpush3.bf16.msra.mxu1 (!%p208_p10), %v1144_v41  ;;  %v1145_v43 = vld [vmem:[%s1502_s3 + $0x8] sm:$0xff] (!%p208_p10)   ;;  %v1146_v44 = vld [vmem:[%s1502_s3 + $0x10] sm:$0xff] (!%p208_p10)   ;;  %1058 = vmatprep.mubr.msk.bf16.mxu1 (!%p208_p10), %vm1234_vm1, %v1233_v42  ;;  %s234_s27 = scalar_lea.vmem (!%p208_p10), [#allocation4], %s233_s16  ;;  %s843_s10 = scalar_lea.sflag (!%p208_p10), [#allocation5], %s233_s16 }
  0x13   : > { %257 = vst [vmem:[#allocation2 + $0x40] sm:$0xff] (!%p208_p10), %v1232_v2  ;;  %258 = vst [vmem:[#allocation2 + $0x48] sm:$0xff] (!%p208_p10), %v1232_v2  ;;  %1044 = vmatprep.subr.bf16.mxu1 (!%p208_p10), %v1233_v42  ;;  %v1147_v45 = vld [vmem:[%s1502_s3 + $0x18] sm:$0xff] (!%p208_p10)   ;;  %v1148_v46 = vld [vmem:[%s1502_s3 + $0x20] sm:$0xff] (!%p208_p10)   ;;  %s855_s29 = sshll.u32 (!%p208_p10), %s234_s27, 4  ;;  %s1235_s11 = smov (!%p208_p10), [#allocation4]   ;;  %s1454_s29 = int_to_ptr.vmem [resolvable:$true] %s855_s29 }
  0x14   : > { %259 = vst [vmem:[#allocation2 + $0x50] sm:$0xff] (!%p208_p10), %v1232_v2  ;;  %260 = vst [vmem:[#allocation2 + $0x58] sm:$0xff] (!%p208_p10), %v1232_v2  ;;  %997 = vmatpush3.bf16.msra.mxu0 (!%p208_p10), %v1121_v1  ;;  %v1149_v47 = vld [vmem:[%s1502_s3 + $0x28] sm:$0xff] (!%p208_p10)   ;;  %v1150_v48 = vld [vmem:[%s1502_s3 + $0x30] sm:$0xff] (!%p208_p10)   ;;  %s1152_s21 = scalar_lea.vmem (!%p208_p10), %s1454_s29, 16  ;;  %s1156_s12 = sshll.u32 (!%p208_p10), %s1235_s11, 4  ;;  %s1157_s12 = int_to_ptr.vmem [resolvable:$false] %s1156_s12 }
  0x15   : > { %261 = vst [vmem:[#allocation2 + $0x60] sm:$0xff] (!%p208_p10), %v1232_v2  ;;  %262 = vst [vmem:[#allocation2 + $0x68] sm:$0xff] (!%p208_p10), %v1232_v2  ;;  %998 = vmatprep.subr.bf16.mxu0 (!%p208_p10), %v1122_v3  ;;  %v1151_v49 = vld [vmem:[%s1502_s3 + $0x38] sm:$0xff] (!%p208_p10)   ;;  %v1410_v50 = vld [vmem:[%s1501_s2] ss:$0 sm:$0xff] (!%p208_p10)  ;;  %p1153_p12 = scmp.ne.s32.totalorder (!%p208_p10), %s1454_s29, %s1152_s21  ;;  %s1158_s13 = scalar_lea.vmem (!%p208_p10), %s1157_s12, 32 }
  0x16   : > { %s1515_s9 = smov (!%p237_p11, %s923_s9), 63  ;;  %263 = vst [vmem:[#allocation2 + $0x70] sm:$0xff] %v1232_v2  ;;  %264 = vst [vmem:[#allocation2 + $0x78] sm:$0xff] %v1232_v2  ;;  %1045 = vmatpush3.bf16.msra.mxu1 %v1145_v43  ;;  %p1159_p1 = scmp.lt.s32.totalorder %s1454_s29, %s1157_s12 }
  0x17   : > { %s924_s14 = sshll.u32 %s1515_s9, 2  ;;  %248 = vst [vmem:[#allocation3] sm:$0x1] %v1233_v42  ;;  %1046 = vmatprep.subr.bf16.mxu1 %v1233_v42  ;;  %s1452_s9 = scalar_lea.hbm %s1504_s5, %s958_s25 }
  0x18   : > { %s1334_s17 = scalar_lea.vmem %s1499_s0, %s924_s14  ;;  %999 = vmatpush3.bf16.msra.mxu0 %v1122_v3  ;;  %p1154_p13 = pnand %p1153_p12, %p1306_p4 }
  0x19   : > { %v1128_v5 = vld [vmem:[%s1334_s17] sm:$0xff]   ;;  %v1129_v6 = vld [vmem:[%s1334_s17 + $0x8] sm:$0xff]   ;;  %v1130_v8 = vld [vmem:[%s1334_s17 + $0x10] sm:$0xff]   ;;  %1000 = vmatprep.subr.bf16.mxu0 %v1123_v4  ;;  %p1160_p2 = scmp.lt.s32.totalorder %s1158_s13, %s1152_s21 }
  0x1a   : > { %394 = vst.msk [vmem:[#allocation2] sm:$0xff] %vm393_vm0, %v1128_v5  ;;  %395 = vst.msk [vmem:[#allocation2 + $0x8] sm:$0xff] %vm393_vm0, %v1129_v6  ;;  %v1131_v9 = vld [vmem:[%s1334_s17 + $0x18] sm:$0xff]   ;;  %v1132_v10 = vld [vmem:[%s1334_s17 + $0x20] sm:$0xff]   ;;  %1047 = vmatpush3.bf16.msra.mxu1 %v1146_v44  ;;  %p1155_p0 = pneg %p1154_p13 }
  0x1b   : > { %396 = vst.msk [vmem:[#allocation2 + $0x10] sm:$0xff] %vm393_vm0, %v1130_v8  ;;  %397 = vst.msk [vmem:[#allocation2 + $0x18] sm:$0xff] %vm393_vm0, %v1131_v9  ;;  %v1133_v11 = vld [vmem:[%s1334_s17 + $0x28] sm:$0xff]   ;;  %v1134_v13 = vld [vmem:[%s1334_s17 + $0x30] sm:$0xff]   ;;  %1048 = vmatprep.subr.bf16.mxu1 %v1233_v42  ;;  %p1161_p3 = por %p1160_p2, %p1159_p1 }
  0x1c   : > { %398 = vst.msk [vmem:[#allocation2 + $0x20] sm:$0xff] %vm393_vm0, %v1132_v10  ;;  %1001 = vmatpush3.bf16.msra.mxu0 %v1123_v4  ;;  %399 = vst.msk [vmem:[#allocation2 + $0x28] sm:$0xff] %vm393_vm0, %v1133_v11  ;;  %v1135_v14 = vld [vmem:[%s1334_s17 + $0x38] sm:$0xff]   ;;  %v1136_v15 = vld [vmem:[%s1334_s17 + $0x40] sm:$0xff]  }
  0x1d   : > { %1002 = vmatprep.subr.bf16.mxu0 %v1124_v7  ;;  %400 = vst.msk [vmem:[#allocation2 + $0x30] sm:$0xff] %vm393_vm0, %v1134_v13  ;;  %401 = vst.msk [vmem:[#allocation2 + $0x38] sm:$0xff] %vm393_vm0, %v1135_v14  ;;  %v1137_v17 = vld [vmem:[%s1334_s17 + $0x48] sm:$0xff]   ;;  %v1138_v18 = vld [vmem:[%s1334_s17 + $0x50] sm:$0xff]   ;;  %p1162_p5 = pnand %p1161_p3, %p1155_p0 }
  0x1e   : > { %402 = vst.msk [vmem:[#allocation2 + $0x40] sm:$0xff] %vm393_vm0, %v1136_v15  ;;  %403 = vst.msk [vmem:[#allocation2 + $0x48] sm:$0xff] %vm393_vm0, %v1137_v17  ;;  %v1139_v20 = vld [vmem:[%s1334_s17 + $0x58] sm:$0xff]   ;;  %v1140_v21 = vld [vmem:[%s1334_s17 + $0x60] sm:$0xff]   ;;  %1049 = vmatpush3.bf16.msra.mxu1 %v1147_v45 }
  0x1f   : > { %404 = vst.msk [vmem:[#allocation2 + $0x50] sm:$0xff] %vm393_vm0, %v1138_v18  ;;  %405 = vst.msk [vmem:[#allocation2 + $0x58] sm:$0xff] %vm393_vm0, %v1139_v20  ;;  %v1141_v23 = vld [vmem:[%s1334_s17 + $0x68] sm:$0xff]   ;;  %v1142_v24 = vld [vmem:[%s1334_s17 + $0x70] sm:$0xff]   ;;  %1050 = vmatprep.subr.bf16.mxu1 %v1233_v42 }
  0x20   : > { %1003 = vmatpush3.bf16.msra.mxu0 %v1124_v7  ;;  %406 = vst.msk [vmem:[#allocation2 + $0x60] sm:$0xff] %vm393_vm0, %v1140_v21  ;;  %407 = vst.msk [vmem:[#allocation2 + $0x68] sm:$0xff] %vm393_vm0, %v1141_v23  ;;  %v1143_v25 = vld [vmem:[%s1334_s17 + $0x78] sm:$0xff]  }
  0x21   : > { %v410_v16 = vld [vmem:[#allocation2] sm:$0xff]  ;;  %1004 = vmatprep.subr.bf16.mxu0 %v1125_v12  ;;  %408 = vst.msk [vmem:[#allocation2 + $0x70] sm:$0xff] %vm393_vm0, %v1142_v24  ;;  %409 = vst.msk [vmem:[#allocation2 + $0x78] sm:$0xff] %vm393_vm0, %v1143_v25  ;;  %v411_v26 = vld [vmem:[#allocation2 + $0x8] sm:$0xff] }
  0x22   : > { %1010 = vmatprep.mubr.bf16.mxu0 %v410_v16  ;;  %v412_v27 = vld [vmem:[#allocation2 + $0x10] sm:$0xff]  ;;  %v413_v28 = vld [vmem:[#allocation2 + $0x18] sm:$0xff]  ;;  %1051 = vmatpush3.bf16.msra.mxu1 %v1148_v46 }
  0x23   : > { %v414_v29 = vld [vmem:[#allocation2 + $0x20] sm:$0xff]  ;;  %v415_v30 = vld [vmem:[#allocation2 + $0x28] sm:$0xff]  ;;  %1052 = vmatprep.subr.bf16.mxu1 %v1233_v42 }
  0x24   : > { %1005 = vmatpush3.bf16.msra.mxu0 %v1125_v12  ;;  %v416_v31 = vld [vmem:[#allocation2 + $0x30] sm:$0xff]  ;;  %v417_v32 = vld [vmem:[#allocation2 + $0x38] sm:$0xff] }
  0x25   : > { %1006 = vmatprep.subr.bf16.mxu0 %v1126_v19  ;;  %v418_v33 = vld [vmem:[#allocation2 + $0x40] sm:$0xff]  ;;  %v419_v34 = vld [vmem:[#allocation2 + $0x48] sm:$0xff] }
  0x26   : > { %v420_v35 = vld [vmem:[#allocation2 + $0x50] sm:$0xff]  ;;  %v421_v36 = vld [vmem:[#allocation2 + $0x58] sm:$0xff]  ;;  %1053 = vmatpush3.bf16.msra.mxu1 %v1149_v47 }
  0x27   : > { %v422_v37 = vld [vmem:[#allocation2 + $0x60] sm:$0xff]  ;;  %v423_v38 = vld [vmem:[#allocation2 + $0x68] sm:$0xff]  ;;  %1054 = vmatprep.subr.bf16.mxu1 %v1233_v42 }
  0x28   : > { %1007 = vmatpush3.bf16.msra.mxu0 %v1126_v19  ;;  %v424_v39 = vld [vmem:[#allocation2 + $0x70] sm:$0xff]  ;;  %v425_v40 = vld [vmem:[#allocation2 + $0x78] sm:$0xff] }
  0x29   : > { %1008 = vmatprep.subr.bf16.mxu0 %v1127_v22 }
  0x2a   : > { %1055 = vmatpush3.bf16.msra.mxu1 %v1150_v48 }
  0x2b   : > { %1056 = vmatprep.subr.bf16.mxu1 %v1233_v42 }
  0x2c   : > { %1009 = vmatpush3.bf16.msra.mxu0 %v1127_v22 }
  0x2e   : > { %1057 = vmatpush3.bf16.msra.mxu1 %v1151_v49 }
  0x2f   : > { %1011 = vmatmul.mubr.bf16.vlgmr.msra.gmra.mrb[0].mxu0 %v411_v26 }
  0x30   : > { %1014 = vmatprep.mubr.bf16.mxu0 %v412_v27 }
  0x37   : > { %1015 = vmatmul.mubr.bf16.gmra.mrb[4].mxu0 %v413_v28 }
  0x38   : > { %1018 = vmatprep.mubr.bf16.mxu0 %v414_v29 }
  0x3f   : > { %1019 = vmatmul.mubr.bf16.gmra.mrb[8].mxu0 %v415_v30 }
  0x40   : > { %1022 = vmatprep.mubr.bf16.mxu0 %v416_v31 }
  0x47   : > { %1023 = vmatmul.mubr.bf16.gmra.mrb[12].mxu0 %v417_v32 }
  0x48   : > { %1026 = vmatprep.mubr.bf16.mxu0 %v418_v33 }
  0x4f   : > { %1027 = vmatmul.mubr.bf16.gmra.mrb[16].mxu0 %v419_v34 }
  0x50   : > { %1030 = vmatprep.mubr.bf16.mxu0 %v420_v35 }
  0x57   : > { %1031 = vmatmul.mubr.bf16.gmra.mrb[20].mxu0 %v421_v36 }
  0x58   : > { %1034 = vmatprep.mubr.bf16.mxu0 %v422_v37 }
  0x5f   : > { %1035 = vmatmul.mubr.bf16.gmra.mrb[24].mxu0 %v423_v38 }
  0x60   : > { %1038 = vmatprep.mubr.bf16.mxu0 %v424_v39 }
  0x67   : > { %1039 = vmatmul.mubr.bf16.gmra.mrb[28].mxu0 %v425_v40 }
 0x102   : > { %v1012_v51 = vpop.f32.mrb[0].mxu0 }
 0x103   : > { %v531_v52 = vpop.f32.mrb[1].mxu0  ;;  %v540_v56 = vadd.f32 %v1012_v51, %v1410_v50 }
 0x104   : > { %v532_v53 = vadd.f32 %v1410_v50, %v531_v52  ;;  %v1013_v54 = vpop.f32.mrb[2].mxu0 }
 0x105   : > { %v534_v55 = vpop.f32.mrb[3].mxu0  ;;  %v543_v59 = vadd.f32 %v1013_v54, %v1410_v50  ;;  %v660_v61 = vmax.f32 %v540_v56, 0.0 }
 0x106   : > { %v535_v57 = vadd.f32 %v1410_v50, %v534_v55  ;;  %v658_v58 = vmax.f32 %v532_v53, 0.0 }
 0x107   : > { %v661_v1 = vmax.f32 %v543_v59, 0.0 }
 0x108   : > { %v659_v60 = vmax.f32 %v535_v57, 0.0 }
 0x10a   : > { %v690_v62 = vadd.f32 %v659_v60, %v658_v58  ;;  %v1016_v63 = vpop.f32.mrb[4].mxu0 }
 0x10b   : > { %v547_v0 = vpop.f32.mrb[5].mxu0  ;;  %v556_v6 = vadd.f32 %v1016_v63, %v1410_v50 }
 0x10c   : > { %v691_v2 = vadd.f32 %v690_v62, %v660_v61  ;;  %v548_v3 = vadd.f32 %v1410_v50, %v547_v0  ;;  %v1017_v4 = vpop.f32.mrb[6].mxu0 }
 0x10d   : > { %v550_v5 = vpop.f32.mrb[7].mxu0  ;;  %v559_v11 = vadd.f32 %v1017_v4, %v1410_v50  ;;  %v664_v13 = vmax.f32 %v556_v6, 0.0 }
 0x10e   : > { %v662_v7 = vmax.f32 %v548_v3, 0.0  ;;  %v692_v8 = vadd.f32 %v691_v2, %v661_v1  ;;  %v551_v9 = vadd.f32 %v1410_v50, %v550_v5 }
 0x10f   : > { %v665_v17 = vmax.f32 %v559_v11, 0.0 }
 0x110   : > { %v693_v10 = vadd.f32 %v692_v8, %v662_v7  ;;  %v663_v12 = vmax.f32 %v551_v9, 0.0 }
 0x112   : > { %v694_v14 = vadd.f32 %v693_v10, %v663_v12  ;;  %v1020_v15 = vpop.f32.mrb[8].mxu0 }
 0x113   : > { %v563_v16 = vpop.f32.mrb[9].mxu0  ;;  %v572_v22 = vadd.f32 %v1020_v15, %v1410_v50 }
 0x114   : > { %v695_v18 = vadd.f32 %v694_v14, %v664_v13  ;;  %v564_v19 = vadd.f32 %v1410_v50, %v563_v16  ;;  %v1021_v20 = vpop.f32.mrb[10].mxu0 }
 0x115   : > { %v566_v21 = vpop.f32.mrb[11].mxu0  ;;  %v575_v27 = vadd.f32 %v1021_v20, %v1410_v50  ;;  %v668_v29 = vmax.f32 %v572_v22, 0.0 }
 0x116   : > { %v666_v23 = vmax.f32 %v564_v19, 0.0  ;;  %v696_v24 = vadd.f32 %v695_v18, %v665_v17  ;;  %v567_v25 = vadd.f32 %v1410_v50, %v566_v21 }
 0x117   : > { %v669_v33 = vmax.f32 %v575_v27, 0.0 }
 0x118   : > { %v697_v26 = vadd.f32 %v696_v24, %v666_v23  ;;  %v667_v28 = vmax.f32 %v567_v25, 0.0 }
 0x11a   : > { %v698_v30 = vadd.f32 %v697_v26, %v667_v28  ;;  %v1024_v31 = vpop.f32.mrb[12].mxu0 }
 0x11b   : > { %v579_v32 = vpop.f32.mrb[13].mxu0  ;;  %v588_v38 = vadd.f32 %v1024_v31, %v1410_v50 }
 0x11c   : > { %v699_v34 = vadd.f32 %v698_v30, %v668_v29  ;;  %v580_v35 = vadd.f32 %v1410_v50, %v579_v32  ;;  %v1025_v36 = vpop.f32.mrb[14].mxu0 }
 0x11d   : > { %v582_v37 = vpop.f32.mrb[15].mxu0  ;;  %v591_v43 = vadd.f32 %v1025_v36, %v1410_v50  ;;  %v672_v45 = vmax.f32 %v588_v38, 0.0 }
 0x11e   : > { %v670_v39 = vmax.f32 %v580_v35, 0.0  ;;  %v700_v40 = vadd.f32 %v699_v34, %v669_v33  ;;  %v583_v41 = vadd.f32 %v1410_v50, %v582_v37 }
 0x11f   : > { %v673_v49 = vmax.f32 %v591_v43, 0.0 }
 0x120   : > { %v701_v42 = vadd.f32 %v700_v40, %v670_v39  ;;  %v671_v44 = vmax.f32 %v583_v41, 0.0 }
 0x122   : > { %v702_v46 = vadd.f32 %v701_v42, %v671_v44  ;;  %v1028_v47 = vpop.f32.mrb[16].mxu0 }
 0x123   : > { %v595_v48 = vpop.f32.mrb[17].mxu0  ;;  %v604_v55 = vadd.f32 %v1028_v47, %v1410_v50 }
 0x124   : > { %v703_v51 = vadd.f32 %v702_v46, %v672_v45  ;;  %v596_v52 = vadd.f32 %v1410_v50, %v595_v48  ;;  %v1029_v53 = vpop.f32.mrb[18].mxu0 }
 0x125   : > { %v598_v54 = vpop.f32.mrb[19].mxu0  ;;  %v607_v60 = vadd.f32 %v1029_v53, %v1410_v50  ;;  %v676_v62 = vmax.f32 %v604_v55, 0.0 }
 0x126   : > { %v674_v56 = vmax.f32 %v596_v52, 0.0  ;;  %v704_v57 = vadd.f32 %v703_v51, %v673_v49  ;;  %v599_v58 = vadd.f32 %v1410_v50, %v598_v54 }
 0x127   : > { %v677_v2 = vmax.f32 %v607_v60, 0.0 }
 0x128   : > { %v705_v59 = vadd.f32 %v704_v57, %v674_v56  ;;  %v675_v61 = vmax.f32 %v599_v58, 0.0  ;;  %v728_v57 = vld [vmem:[#allocation3] sm:$0x1] }
 0x12a   : > { %v706_v63 = vadd.f32 %v705_v59, %v675_v61  ;;  %v1032_v0 = vpop.f32.mrb[20].mxu0 }
 0x12b   : > { %v611_v1 = vpop.f32.mrb[21].mxu0  ;;  %v620_v7 = vadd.f32 %v1032_v0, %v1410_v50 }
 0x12c   : > { %v707_v3 = vadd.f32 %v706_v63, %v676_v62  ;;  %v612_v4 = vadd.f32 %v1410_v50, %v611_v1  ;;  %v1033_v5 = vpop.f32.mrb[22].mxu0 }
 0x12d   : > { %v614_v6 = vpop.f32.mrb[23].mxu0  ;;  %v623_v12 = vadd.f32 %v1033_v5, %v1410_v50  ;;  %v680_v14 = vmax.f32 %v620_v7, 0.0 }
 0x12e   : > { %v678_v8 = vmax.f32 %v612_v4, 0.0  ;;  %v708_v9 = vadd.f32 %v707_v3, %v677_v2  ;;  %v615_v10 = vadd.f32 %v1410_v50, %v614_v6 }
 0x12f   : > { %v681_v18 = vmax.f32 %v623_v12, 0.0 }
 0x130   : > { %v709_v11 = vadd.f32 %v708_v9, %v678_v8  ;;  %v679_v13 = vmax.f32 %v615_v10, 0.0 }
 0x132   : > { %v710_v15 = vadd.f32 %v709_v11, %v679_v13  ;;  %v1036_v16 = vpop.f32.mrb[24].mxu0 }
 0x133   : > { %v627_v17 = vpop.f32.mrb[25].mxu0  ;;  %v636_v23 = vadd.f32 %v1036_v16, %v1410_v50 }
 0x134   : > { %v711_v19 = vadd.f32 %v710_v15, %v680_v14  ;;  %v628_v20 = vadd.f32 %v1410_v50, %v627_v17  ;;  %v1037_v21 = vpop.f32.mrb[26].mxu0 }
 0x135   : > { %v630_v22 = vpop.f32.mrb[27].mxu0  ;;  %v639_v28 = vadd.f32 %v1037_v21, %v1410_v50  ;;  %v684_v30 = vmax.f32 %v636_v23, 0.0 }
 0x136   : > { %v682_v24 = vmax.f32 %v628_v20, 0.0  ;;  %v712_v25 = vadd.f32 %v711_v19, %v681_v18  ;;  %v631_v26 = vadd.f32 %v1410_v50, %v630_v22 }
 0x137   : > { %v685_v34 = vmax.f32 %v639_v28, 0.0 }
 0x138   : > { %v713_v27 = vadd.f32 %v712_v25, %v682_v24  ;;  %v683_v29 = vmax.f32 %v631_v26, 0.0 }
 0x13a   : > { %v714_v31 = vadd.f32 %v713_v27, %v683_v29  ;;  %v1040_v32 = vpop.f32.mrb[28].mxu0 }
 0x13b   : > { %v643_v33 = vpop.f32.mrb[29].mxu0  ;;  %v652_v39 = vadd.f32 %v1040_v32, %v1410_v50 }
 0x13c   : > { %v715_v35 = vadd.f32 %v714_v31, %v684_v30  ;;  %v644_v36 = vadd.f32 %v1410_v50, %v643_v33  ;;  %v1041_v37 = vpop.f32.mrb[30].mxu0 }
 0x13d   : > { %v646_v38 = vpop.f32.mrb[31].mxu0  ;;  %v655_v44 = vadd.f32 %v1041_v37, %v1410_v50  ;;  %v688_v46 = vmax.f32 %v652_v39, 0.0 }
 0x13e   : > { %v686_v40 = vmax.f32 %v644_v36, 0.0  ;;  %v716_v41 = vadd.f32 %v715_v35, %v685_v34  ;;  %v647_v42 = vadd.f32 %v1410_v50, %v646_v38  ;;  %v752_v50 = vld [vmem:[%s1503_s4] sm:$0x1] }
 0x13f   : > { %v689_v48 = vmax.f32 %v655_v44, 0.0 }
 0x140   : > { %v717_v43 = vadd.f32 %v716_v41, %v686_v40  ;;  %v687_v45 = vmax.f32 %v647_v42, 0.0 }
 0x142   : > { %v718_v47 = vadd.f32 %v717_v43, %v687_v45 }
 0x144   : > { %v719_v49 = vadd.f32 %v718_v47, %v688_v46 }
 0x146   : > { %v720_v51 = vadd.f32 %v719_v49, %v689_v48 }
 0x148   : > { %v721_v52 = vrot.slane %v720_v51, 4 }
 0x14a   : > { %v722_v53 = vadd.f32 %v721_v52, %v720_v51 }
 0x14c   : > { %v723_v54 = vrot.slane %v722_v53, 2 }
 0x14e   : > { %v724_v55 = vadd.f32 %v723_v54, %v722_v53 }
 0x150   : > { %v725_v56 = vrot.slane %v724_v55, 1 }
 0x152   : > { %v726_v58 = vadd.f32 %v725_v56, %v724_v55 }
 0x154   : > { %v729_v59 = vadd.f32 %v728_v57, %v726_v58 }
 0x156   : > { %730 = vst [vmem:[#allocation3] sm:$0x1] %v729_v59 }
 0x15d   : > { %v734_v60 = vld [vmem:[#allocation3] sm:$0x1] }
 0x15e   : > { %v735_v61 = vpack.c.bf16 %v734_v60, %v734_v60 }
 0x160   : > { %1059 = vmatmul.mubr.bf16.vlgmr.msra.gmra.mrb[0].mxu1 %v735_v61 }
 0x233   : > { %v835_v62 = vpop.f32.mrb[0].mxu1 }
 0x234   : > { %v836_v63 = vadd.f32 %v835_v62, %v752_v50  ;;  %v1060_v0 = vpop.f32.mrb[1].mxu1 }
 0x235   : > { %v838_v1 = vpop.f32.mrb[2].mxu1 }
 0x236   : > { %841 = vst [vmem:[%s234_s27] sm:$0x1] %v836_v63  ;;  %v1061_v2 = vpop.f32.mrb[3].mxu1 }
 0x237   : > { %1165 = shalt.err (!%p1162_p5)
}
 0x238   : > { %s1166_s14 = scalar_lea.hbm %s1452_s9, 16  ;;  %s1170_s17 = scalar_lea.hbm %s1504_s5, 32 }
 0x239   : > { %p1167_p6 = scmp.ne.s32.totalorder %s1452_s9, %s1166_s14  ;;  %p1171_p10 = scmp.lt.u32.totalorder %s1452_s9, %s1504_s5 }
 0x23a   : > { %p1172_p11 = scmp.lt.u32.totalorder %s1170_s17, %s1166_s14  ;;  %p1174_p13 = scmp.lt.u32.totalorder %s1166_s14, %s1452_s9 }
 0x23b   : > { %p1168_p7 = pnand %p1167_p6, %p1306_p4 }
 0x23c   : > { %p1173_p12 = por %p1172_p11, %p1171_p10 }
 0x23d   : > { %p1169_p9 = pneg %p1168_p7 }
 0x23e   : > { %p1175_p0 = por %p1174_p13, %p1173_p12 }
 0x240   : > { %p1176_p1 = pnand %p1175_p0, %p1169_p9 }
 0x242   : > { %1179 = shalt.err (!%p1176_p1)
}
 0x243   : > { %1062 = dma.vmem_to_hbm [thread:$0]  (%p1306_p4), %s1454_s29, 16, %s1452_s9, %s843_s10  }
 0x244 PF: > { %p1068_p2 = scmp.ge.s32.totalorder %s1230_s23, 2  ;;  %s867_s27 = sand.u32 1, %s1210_s18  }
 0x245   : > { %s868_s7 = scalar_lea.sflag [#allocation5], %s867_s27 }
 0x246   : > { %p1065_p3 = pnand %p1068_p2, %p1313_p8 }
 0x248   : > { %1205 = dma.done.wait (!%p1065_p3), %s868_s7, 16  }
 0x249   : > { %1207 = vsyncadd (!%p1065_p3), %s868_s7, 4294967280  ;;  %s18_s23 = sadd.s32 1, %s1230_s23   ;;  %s1507_s18 = smov %s1214_s19 }
 0x24a   : > { %p15_p5 = scmp.ge.s32.totalorder %s18_s23, 4   ;;  %s1508_s19 = smov %s1218_s20 }
 0x24b   : > { %s1509_s20 = smov %s1319_s6  ;;  %s1510_s21 = smov %s1226_s22 }
 0x24c   : > { %s1511_s22 = smov %s1513_s26  ;;  %17 = sbr.rel (!%p15_p5) target bundleno = 4 (0x4), region = 83 }
 0x253   :  { %872 = vsyncpa [#allocation5], 1 }
 0x254   :  { %874 = vsyncpa [#allocation5 + $0x1], 1 }

</bundles_post_ra>
